<compile_context>
chip_gen: v7x
topology: tpu7x:2x2x1
jax: 0.10.0
libtpu: 0.0.40
codegen_flags: <defaults>
</compile_context>

<pallas_src>
import functools

import jax
import jax.numpy as jnp
from jax.experimental import pallas as pl
from jax.experimental.pallas import tpu as pltpu

_EPS = 1e-6  # torch F.pairwise_distance default eps


def _contrastive_loss_kernel(margin_ref, o1_ref, o2_ref, label_ref, out_ref,
                             *, batch_size, tile_b, tiles_per_split,
                             needs_mask):
    c = pl.program_id(0)   # split index (parallel; sharded across TCs on v7x)
    i = pl.program_id(1)   # tile index inside the split (reduction axis)

    @pl.when(i == 0)
    def _():
        out_ref[...] = jnp.zeros_like(out_ref)

    # Cast in-register; inputs arrive in their native dtype (bf16/fp16/f32).
    o1 = o1_ref[...].astype(jnp.float32)                  # (TB, D)
    o2 = o2_ref[...].astype(jnp.float32)
    label = label_ref[...].astype(jnp.float32)            # (TB, 1)

    diff = o1 - o2 + _EPS                                 # torch adds eps pre-norm
    sumsq = jnp.sum(diff * diff, axis=-1, keepdims=True)  # (TB, 1) == d^2
    d = jnp.sqrt(sumsq)                                   # EUP sqrt

    margin = margin_ref[0]                                # SMEM scalar
    pos = (1.0 - label) * sumsq                           # use d^2 directly
    neg = label * jnp.square(jnp.maximum(margin - d, 0.0))
    per_row = pos + neg                                   # (TB, 1)

    if needs_mask:
        # Intended (unclamped) global tile; phantom/partial rows are zeroed via
        # a select (do NOT turn this into a mask-multiply: padded rows hold
        # unspecified data and NaN/Inf would propagate through a multiply).
        tile = c * tiles_per_split + i
        row = tile * tile_b + jax.lax.broadcasted_iota(jnp.int32,
                                                       per_row.shape, 0)
        per_row = jnp.where(row < batch_size, per_row, 0.0)

    out_ref[...] += jnp.sum(per_row, keepdims=True)       # (1, 1) partial sum


def _vmem_limit_bytes():
    """Generation-aware scoped-VMEM limit (explicit; never rely on defaults)."""
    try:
        cap = int(pltpu.get_tpu_info().vmem_capacity_bytes)
    except Exception:
        cap = 64 * 1024 * 1024  # conservative: v7x physical VMEM per TC
    # 128 MiB (v5e/v6e) -> 64 MiB limit; 64 MiB (v7x) -> 32 MiB limit.
    return int(min(64 * 1024 * 1024, max(32 * 1024 * 1024, cap // 2)))


def _choose_tile_b(batch, feat, dtype, vmem_limit):
    """Pick TB from the *padded* VMEM footprint of a (TB, D) block."""
    itemsize = jnp.dtype(dtype).itemsize
    # Sublane packing: f32 -> 8, bf16/fp16 -> 16, int8/fp8 -> 32.
    sublane = max(8, 8 * (4 // max(1, itemsize)))
    lane_padded_feat = -(-feat // 128) * 128               # round_up(D, 128)
    bytes_per_row = lane_padded_feat * itemsize
    # 2 inputs x 2 pipeline buffers should sit within ~3/4 of the VMEM limit;
    # cap each block at ~8 MiB (diminishing returns beyond on the roofline).
    per_block = min(8 * 1024 * 1024, (vmem_limit * 3 // 4) // 4)
    tb = per_block // max(1, bytes_per_row)
    if tb >= batch:
        return batch                       # one block covering the full batch
    return max(sublane, (tb // sublane) * sublane)


def contrastive_loss(output1, output2, label, margin=1.0, *, tile_b=None,
                     num_splits=None):
    B, D = output1.shape
    label2d = jnp.reshape(label, (B, 1))

    vmem_limit = _vmem_limit_bytes()
    if tile_b is None:
        tile_b = _choose_tile_b(B, D, output1.dtype, vmem_limit)
    tiles_total = pl.cdiv(B, tile_b)

    # Two partial sums so Mosaic can shard the leading "parallel" axis across
    # both TensorCores on v7x; on 1-TC chips the extra axis is free.
    if num_splits is None:
        num_splits = 2 if tiles_total >= 2 else 1
    num_splits = min(num_splits, tiles_total)
    tiles_per_split = pl.cdiv(tiles_total, num_splits)

    needs_mask = (B % tile_b != 0) or (tiles_total % num_splits != 0)

    def in_map(c, i):
        t = c * tiles_per_split + i
        # Clamp phantom tiles (odd tile counts) to a valid block; the in-kernel
        # row mask zeroes their contribution.
        return (jnp.minimum(t, tiles_total - 1), 0)

    margin_arr = jnp.asarray([margin], dtype=jnp.float32)
    kernel = functools.partial(
        _contrastive_loss_kernel, batch_size=B, tile_b=tile_b,
        tiles_per_split=tiles_per_split, needs_mask=needs_mask)

    partials = pl.pallas_call(
        kernel,
        out_shape=jax.ShapeDtypeStruct((num_splits, 1), jnp.float32),
        grid_spec=pltpu.PrefetchScalarGridSpec(
            num_scalar_prefetch=0,
            grid=(num_splits, tiles_per_split),
            in_specs=[
                pl.BlockSpec(memory_space=pltpu.MemorySpace.SMEM),  # margin
                pl.BlockSpec((tile_b, D), in_map),                  # output1 tile
                pl.BlockSpec((tile_b, D), in_map),                  # output2 tile
                pl.BlockSpec((tile_b, 1), in_map),                  # label tile
            ],
            # One resident (1,1) accumulator per split; no VMEM scratch needed.
            out_specs=pl.BlockSpec((1, 1), lambda c, i: (c, 0)),
        ),
        compiler_params=pltpu.CompilerParams(
            dimension_semantics=("parallel", "arbitrary"),
            vmem_limit_bytes=vmem_limit,
        ),
        # TODO(synk): if profiling shows exposed DMA at step boundaries, sweep
        # pipeline_mode=pl.Buffered(3) on the two large input specs.
    )(margin_arr, output1, output2, label2d)

    return jnp.sum(partials) * (1.0 / B)


def _reference(o1, o2, label, margin):
    o1 = o1.astype(jnp.float32)
    o2 = o2.astype(jnp.float32)
    label = jnp.reshape(label, (o1.shape[0], 1)).astype(jnp.float32)
    d = jnp.sqrt(jnp.sum((o1 - o2 + _EPS) ** 2, axis=-1, keepdims=True))
    return jnp.mean((1.0 - label) * d ** 2
                    + label * jnp.square(jnp.maximum(margin - d, 0.0)))


if __name__ == "__main__":
    key = jax.random.PRNGKey(0)
    k1, k2, k3 = jax.random.split(key, 3)

    # Case 1: small single-tile problem, f32 inputs, default margin (mask elided).
    B, D = 8, 32
    o1 = jax.random.normal(k1, (B, D), dtype=jnp.float32)
    o2 = jax.random.normal(k2, (B, D), dtype=jnp.float32)
    lab = jax.random.bernoulli(k3, 0.5, (B, 1)).astype(jnp.float32)

    loss = contrastive_loss(o1, o2, lab)
    jax.block_until_ready(loss)
    ref = _reference(o1, o2, lab, 1.0)
    assert jnp.allclose(loss, ref, rtol=1e-5, atol=1e-6), (loss, ref)

    # Case 2: batch tiling, 2-way split with a phantom tile, partial-last-tile
    # masking and a runtime margin.
    B2, D2, TB2 = 20, 32, 8
    k4, k5, k6 = jax.random.split(jax.random.PRNGKey(1), 3)
    o1b = jax.random.normal(k4, (B2, D2), dtype=jnp.float32)
    o2b = jax.random.normal(k5, (B2, D2), dtype=jnp.float32)
    labb = jax.random.bernoulli(k6, 0.5, (B2, 1)).astype(jnp.float32)

    loss2 = contrastive_loss(o1b, o2b, labb, margin=2.0, tile_b=TB2)
    jax.block_until_ready(loss2)
    ref2 = _reference(o1b, o2b, labb, 2.0)
    assert jnp.allclose(loss2, ref2, rtol=1e-5, atol=1e-6), (loss2, ref2)

    # Case 3: bf16 inputs (native-dtype DMA, in-register f32 cast).
    B3, D3 = 16, 256
    k7, k8, k9 = jax.random.split(jax.random.PRNGKey(2), 3)
    o1c = jax.random.normal(k7, (B3, D3), dtype=jnp.bfloat16)
    o2c = jax.random.normal(k8, (B3, D3), dtype=jnp.bfloat16)
    labc = jax.random.bernoulli(k9, 0.5, (B3, 1)).astype(jnp.float32)

    loss3 = contrastive_loss(o1c, o2c, labc, margin=1.5)
    jax.block_until_ready(loss3)
    ref3 = _reference(o1c, o2c, labc, 1.5)
    assert jnp.allclose(loss3, ref3, rtol=1e-4, atol=1e-6), (loss3, ref3)

    print("KERNEL_OK")
</pallas_src>

<mosaic_0001>
module attributes {stable_mosaic.version = 11 : i64} {
  func.func @_contrastive_loss_kernel(%arg0: i32, %arg1: i32, %arg2: memref<1xf32, #tpu.memory_space<smem>>, %arg3: memref<8x32xf32, #tpu.memory_space<vmem>>, %arg4: memref<8x32xf32, #tpu.memory_space<vmem>>, %arg5: memref<8x1xf32, #tpu.memory_space<vmem>>, %arg6: memref<1x1xf32, #tpu.memory_space<vmem>>) attributes {dimension_semantics = [#tpu.dimension_semantics<parallel>, #tpu.dimension_semantics<arbitrary>], iteration_bounds = array<i64: 1, 1>, scalar_prefetch = 0 : i64, scratch_operands = 0 : i64, tpu.core_type = #tpu.core_type<tc>, window_params = [{transform_indices = @transform_0, window_bounds = array<i64: 1>}, {transform_indices = @transform_1, window_bounds = array<i64: 8, 32>}, {transform_indices = @transform_2, window_bounds = array<i64: 8, 32>}, {transform_indices = @transform_3, window_bounds = array<i64: 8, 1>}, {transform_indices = @transform_4, window_bounds = array<i64: 1, 1>}]} {
    %c0_i32 = arith.constant 0 : i32
    %0 = arith.cmpi eq, %arg1, %c0_i32 : i32
    %1 = arith.extui %0 : i1 to i32
    %c0_i32_0 = arith.constant 0 : i32
    %2 = arith.cmpi ne, %1, %c0_i32_0 : i32
    scf.if %2 {
      %cst_15 = arith.constant 0.000000e+00 : f32
      %32 = vector.broadcast %cst_15 : f32 to vector<1x1xf32>
      %c0_16 = arith.constant 0 : index
      %c0_17 = arith.constant 0 : index
      %33 = vector.load %arg6[%c0_16, %c0_17] : memref<1x1xf32, #tpu.memory_space<vmem>>, vector<1x1xf32>
      tpu.vector_store %arg6[%c0_16, %c0_17], %32 {strides = array<i32>} : memref<1x1xf32, #tpu.memory_space<vmem>>, vector<1x1xf32>,
    } else {
    }
    %c0 = arith.constant 0 : index
    %c0_1 = arith.constant 0 : index
    %3 = vector.load %arg3[%c0, %c0_1] : memref<8x32xf32, #tpu.memory_space<vmem>>, vector<8x32xf32>
    %c0_2 = arith.constant 0 : index
    %c0_3 = arith.constant 0 : index
    %4 = vector.load %arg4[%c0_2, %c0_3] : memref<8x32xf32, #tpu.memory_space<vmem>>, vector<8x32xf32>
    %c0_4 = arith.constant 0 : index
    %c0_5 = arith.constant 0 : index
    %5 = vector.load %arg5[%c0_4, %c0_5] : memref<8x1xf32, #tpu.memory_space<vmem>>, vector<8x1xf32>
    %6 = arith.subf %3, %4 : vector<8x32xf32>
    %cst = arith.constant 9.99999997E-7 : f32
    %7 = vector.broadcast %cst : f32 to vector<8x32xf32>
    %8 = arith.addf %6, %7 : vector<8x32xf32>
    %9 = arith.mulf %8, %8 : vector<8x32xf32>
    %cst_6 = arith.constant dense<0.000000e+00> : vector<8xf32>
    %10 = vector.multi_reduction <add>, %9, %cst_6 [1] : vector<8x32xf32> to vector<8xf32>
    %11 = vector.shape_cast %10 : vector<8xf32> to vector<8x1xf32>
    %12 = math.sqrt %11 : vector<8x1xf32>
    %c0_7 = arith.constant 0 : index
    %13 = memref.load %arg2[%c0_7] : memref<1xf32, #tpu.memory_space<smem>>
    %cst_8 = arith.constant 1.000000e+00 : f32
    %14 = vector.broadcast %cst_8 : f32 to vector<8x1xf32>
    %15 = arith.subf %14, %5 : vector<8x1xf32>
    %16 = arith.mulf %15, %11 : vector<8x1xf32>
    %17 = vector.broadcast %13 : f32 to vector<8x1xf32>
    %18 = arith.subf %17, %12 : vector<8x1xf32>
    %cst_9 = arith.constant 0.000000e+00 : f32
    %19 = vector.broadcast %cst_9 : f32 to vector<8x1xf32>
    %20 = arith.maximumf %18, %19 : vector<8x1xf32>
    %21 = arith.mulf %20, %20 : vector<8x1xf32>
    %22 = arith.mulf %5, %21 : vector<8x1xf32>
    %23 = arith.addf %16, %22 : vector<8x1xf32>
    %c0_10 = arith.constant 0 : index
    %c0_11 = arith.constant 0 : index
    %24 = vector.load %arg6[%c0_10, %c0_11] : memref<1x1xf32, #tpu.memory_space<vmem>>, vector<1x1xf32>
    %25 = vector.shape_cast %23 : vector<8x1xf32> to vector<1x8x1xf32>
    %cst_12 = arith.constant dense<0.000000e+00> : vector<1xf32>
    %26 = vector.multi_reduction <add>, %25, %cst_12 [1, 2] : vector<1x8x1xf32> to vector<1xf32>
    %27 = vector.shape_cast %26 : vector<1xf32> to vector<1x1x1xf32>
    %28 = vector.extract %27[0, 0, 0] : f32 from vector<1x1x1xf32>
    %29 = vector.broadcast %28 : f32 to vector<1x1xf32>
    %30 = arith.addf %24, %29 : vector<1x1xf32>
    %c0_13 = arith.constant 0 : index
    %c0_14 = arith.constant 0 : index
    %31 = vector.load %arg6[%c0_13, %c0_14] : memref<1x1xf32, #tpu.memory_space<vmem>>, vector<1x1xf32>
    tpu.vector_store %arg6[%c0_13, %c0_14], %30 {strides = array<i32>} : memref<1x1xf32, #tpu.memory_space<vmem>>, vector<1x1xf32>,
    return
  }
  func.func @transform_0(%arg0: i32, %arg1: i32) -> i32 {
    %c0_i32 = arith.constant 0 : i32
    %c0_i32_0 = arith.constant 0 : i32
    return %c0_i32 : i32
  }
  func.func @transform_1(%arg0: i32, %arg1: i32) -> (i32, i32) {
    %c1_i32 = arith.constant 1 : i32
    %0 = arith.muli %arg0, %c1_i32 : i32
    %1 = arith.addi %0, %arg1 : i32
    %c0_i32 = arith.constant 0 : i32
    %2 = arith.minsi %1, %c0_i32 : i32
    %c0_i32_0 = arith.constant 0 : i32
    %c0_i32_1 = arith.constant 0 : i32
    return %2, %c0_i32_0 : i32, i32
  }
  func.func @transform_2(%arg0: i32, %arg1: i32) -> (i32, i32) {
    %c1_i32 = arith.constant 1 : i32
    %0 = arith.muli %arg0, %c1_i32 : i32
    %1 = arith.addi %0, %arg1 : i32
    %c0_i32 = arith.constant 0 : i32
    %2 = arith.minsi %1, %c0_i32 : i32
    %c0_i32_0 = arith.constant 0 : i32
    %c0_i32_1 = arith.constant 0 : i32
    return %2, %c0_i32_0 : i32, i32
  }
  func.func @transform_3(%arg0: i32, %arg1: i32) -> (i32, i32) {
    %c1_i32 = arith.constant 1 : i32
    %0 = arith.muli %arg0, %c1_i32 : i32
    %1 = arith.addi %0, %arg1 : i32
    %c0_i32 = arith.constant 0 : i32
    %2 = arith.minsi %1, %c0_i32 : i32
    %c0_i32_0 = arith.constant 0 : i32
    %c0_i32_1 = arith.constant 0 : i32
    return %2, %c0_i32_0 : i32, i32
  }
  func.func @transform_4(%arg0: i32, %arg1: i32) -> (i32, i32) {
    %c0_i32 = arith.constant 0 : i32
    %c0_i32_0 = arith.constant 0 : i32
    return %arg0, %c0_i32 : i32, i32
  }
}

</mosaic_0001>

<bundles_post_ra>
// kernel: tpu_custom_call.1
= control target key start
LH: loop header
LB: loop body
LE: loop exit
PB: predicated region body
PF: predicated region fallthrough
CT: control target
= control target key end

     0   :  { %s263_s0 = inlined_call_operand.<no memory space> [shape: f32[1], index: 0, kind: input, shape index: {}]   ;;  %s264_s1 = inlined_call_operand.vmem [shape: f32[8,32], index: 1, kind: input, shape index: {}]   ;;  %s265_s2 = inlined_call_operand.vmem [shape: f32[8,32], index: 2, kind: input, shape index: {}]   ;;  %s266_s3 = inlined_call_operand.vmem [shape: f32[8,1], index: 3, kind: input, shape index: {}]   ;;  %s267_s4 = inlined_call_operand.hbm [shape: f32[1,1], index: 4, kind: output, shape index: {}]  }
   0x1   :  { %v106_v0 = vld [vmem:[%s264_s1] sm:$0xff] }
   0x2   :  { %v107_v1 = vld [vmem:[%s265_s2] sm:$0xff] }
   0x3   :  { %10 = vsyncpa [#allocation4], 0  ;;  %v109_v2 = vsub.f32 %v106_v0, %v107_v1  ;;  %vm112_vm0 = vcmask 261120   ;;  %v126_v10 = vstv %s263_s0  ;;  %v108_v12 = vld [vmem:[%s266_s3] sm:$0xff]  ;;  %vm133_vm3 = vcmask 7168   ;;  %s211_s0 = smov [#allocation3]  }
   0x4   :  { %v124_v15 = vsub.f32 1.0, %v108_v12  ;;  %vm104_vm4 = vcmask 0   ;;  %v210_v22 = vmov 0.0   ;;  %s154_s3 = sshll.u32 %s211_s0, 4  ;;  %s155_s3 = int_to_ptr.vmem [resolvable:$true] %s154_s3 }
   0x5   :  { %v110_v3 = vadd.f32 1e-06, %v109_v2  ;;  %105 = vst.msk [vmem:[#allocation3] sm:$0x1] %vm104_vm4, %v210_v22  ;;  %s186_s22 = scalar_lea.vmem %s155_s3, 16  ;;  %s190_s23 = scalar_lea.vmem %s155_s3, 32 }
   0x6   :  { %p187_p0 = scmp.ne.s32.totalorder %s155_s3, %s186_s22  ;;  %p191_p1 = scmp.lt.s32.totalorder %s155_s3, %s155_s3 }
   0x7   :  { %v111_v4 = vmul.f32 %v110_v3, %v110_v3  ;;  %p192_p2 = scmp.lt.s32.totalorder %s190_s23, %s186_s22 }
   0x9   :  { %v113_v5 = vsel %vm112_vm0, %v111_v4, 0.0  ;;  %p193_p3 = por %p192_p2, %p191_p1 }
   0xa   :  { %114 = vadd.xlane.f32.xlu0 %v113_v5 }
   0xb   :  { %p194_p4 = pnand %p193_p3, %p187_p0 }
   0xc   :  { %v132_v30 = vld [vmem:[#allocation3] sm:$0x1] }
  0x97   :  { %v115_v6 = vpop.xlane.xlu0 %114 }
  0x98   :  { %184 = vrsqrt.f32 %v115_v6  ;;  %vm118_vm1 = vcmp.eq.f32.partialorder %v115_v6, inf  ;;  %v121_v9 = vand.u32 2147483648, %v115_v6  ;;  %vm120_vm2 = vcmp.eq.f32.partialorder %v115_v6, 0.0 }
  0x99   :  { %v125_v18 = vmul.f32 %v124_v15, %v115_v6 }
  0xa2   :  { %v185_v7 = vpop.eup %184 }
  0xa3   :  { %v117_v8 = vmul.f32 %v185_v7, %v115_v6 }
  0xa5   :  { %v119_v11 = vsel %vm118_vm1, %v115_v6, %v117_v8 }
  0xa6   :  { %v122_v13 = vsel %vm120_vm2, %v121_v9, %v119_v11 }
  0xa7   :  { %v127_v14 = vsub.f32 %v126_v10, %v122_v13 }
  0xa9   :  { %v128_v16 = vmax.f32 %v127_v14, 0.0 }
  0xab   :  { %v129_v17 = vmul.f32 %v128_v16, %v128_v16 }
  0xad   :  { %v130_v19 = vmul.f32 %v129_v17, %v108_v12 }
  0xaf   :  { %v131_v20 = vadd.f32 %v130_v19, %v125_v18 }
  0xb1   :  { %v134_v21 = vsel %vm133_vm3, %v131_v20, 0.0 }
  0xb2   :  { %135 = vadd.xlane.f32.xlu0 %v134_v21 }
 0x13f   :  { %v136_v23 = vpop.xlane.xlu0 %135 }
 0x140   :  { %v137_v24 = vrot.slane %v136_v23, 4 }
 0x142   :  { %v138_v25 = vadd.f32 %v137_v24, %v136_v23 }
 0x144   :  { %v139_v26 = vrot.slane %v138_v25, 2 }
 0x146   :  { %v140_v27 = vadd.f32 %v139_v26, %v138_v25 }
 0x148   :  { %v141_v28 = vrot.slane %v140_v27, 1 }
 0x14a   :  { %v142_v29 = vadd.f32 %v141_v28, %v140_v27 }
 0x14c   :  { %180 = vpush %v142_v29 }
 0x17d   :  { %s181_s21 = spop %180 }
 0x17e   :  { %v144_v31 = vstv %s181_s21 }
 0x17f   :  { %v145_v32 = vadd.f32 %v144_v31, %v132_v30 }
 0x181   :  { %147 = vst.msk [vmem:[#allocation3] sm:$0x1] %vm104_vm4, %v145_v32 }
 0x182   :  { %197 = shalt.err (!%p194_p4)
}
 0x183   :  { %s198_s26 = scalar_lea.hbm %s267_s4, 16 }
 0x184   :  { %p199_p5 = scmp.ne.s32.totalorder %s267_s4, %s198_s26  ;;  %p202_p6 = scmp.lt.u32.totalorder %s198_s26, %s267_s4 }
 0x186   :  { %p204_p7 = pnand %p202_p6, %p199_p5 }
 0x188   :  { %207 = shalt.err (!%p204_p7)
}
 0x189   :  { %157 = dma.vmem_to_hbm [thread:$0]  %s155_s3, 16, %s267_s4, [#allocation4]  }
 0x18a   :  { %208 = dma.done.wait [#allocation4], 16  }
 0x18b   :  { %209 = vsyncadd [#allocation4], 4294967280 }
 0x18c   :  { %161 = vsyncpa [#allocation4], 1 }

</bundles_post_ra>
